<compile_context>
chip_gen: v6e
topology: v6e:2x2x1
jax: 0.10.0
libtpu: 0.0.40
codegen_flags: <defaults>
</compile_context>

<pallas_src>
import functools

import jax
import jax.numpy as jnp
from jax import lax
from jax.experimental import pallas as pl
from jax.experimental.pallas import tpu as pltpu

# Upper bound on 128-lane groups folded per grid step in the reduction-tiled path
# (bounds the statically-unrolled fold length / code size).
_MAX_LANE_GROUPS = 128


def _round_up(a, m):
    return ((a + m - 1) // m) * m


@functools.lru_cache(maxsize=1)
def _vmem_budgets():
    """Per-generation VMEM sizing.

    Defaults are v7x-safe (64 MiB physical VMEM): 12 MiB per double-buffered input
    block, 48 MiB scoped limit.  On v5e/v6e (128 MiB physical VMEM) raise to
    28 MiB / 96 MiB so huge-H*W shapes use fewer grid steps.
    """
    per_buf = 12 * 1024 * 1024
    limit = 48 * 1024 * 1024
    try:
        vmem = getattr(pltpu.get_tpu_info(), "vmem_capacity_bytes", None)
        if vmem is not None and vmem >= 96 * 1024 * 1024:
            per_buf = 28 * 1024 * 1024
            limit = 96 * 1024 * 1024
    except Exception:
        pass  # keep conservative defaults
    return per_buf, limit


def _gap_kernel_single(x_ref, o_ref, *, inv_hw):
    """Full H*W in one block: no accumulator, no phases, direct reduce + store."""
    x = x_ref[...].astype(jnp.float32)  # f32 accumulation (mandatory on v5e, cheap everywhere)
    o_ref[...] = (jnp.sum(x, axis=-1, keepdims=True) * inv_hw).astype(o_ref.dtype)


def _gap_kernel_tiled(x_ref, o_ref, acc_ref, *, hw, thw, inv_hw):
    """Huge H*W: grid = (row tiles, hw tiles), hw is the reduction ("arbitrary") axis.

    acc_ref is a lane-dense (tr, 128) f32 scratch: each step folds the thw lanes of
    the block into 128 lanes with pure VPU adds; the single cross-lane (XLU) reduce,
    inv_hw scale and narrow (tr, 1) store happen only at the last hw step.
    """
    k = pl.program_id(1)
    last = pl.num_programs(1) - 1
    g = thw // 128            # static (thw is a multiple of 128, g <= _MAX_LANE_GROUPS)
    tr = acc_ref.shape[0]

    @pl.when(k == 0)
    def _():
        acc_ref[...] = jnp.zeros_like(acc_ref)

    def fold(mask_partial_tile):
        partial = jnp.zeros((tr, 128), jnp.float32)
        if mask_partial_tile:
            rem = hw - k * thw  # number of valid lanes in this (last, partial) tile
        for j in range(g):      # static slices -> clean aligned vreg loads, VPU adds
            xj = x_ref[:, j * 128:(j + 1) * 128].astype(jnp.float32)
            if mask_partial_tile:
                col = j * 128 + lax.broadcasted_iota(jnp.int32, xj.shape, 1)
                xj = jnp.where(col < rem, xj, 0.0)
            partial = partial + xj
        return partial

    if hw % thw == 0:
        acc_ref[...] += fold(False)
    else:
        # Mask padded lanes only on the last (partial) hw tile; all others are full.
        @pl.when(k != last)
        def _():
            acc_ref[...] += fold(False)

        @pl.when(k == last)
        def _():
            acc_ref[...] += fold(True)

    @pl.when(k == last)
    def _():
        o_ref[...] = (jnp.sum(acc_ref[...], axis=-1, keepdims=True)
                      * inv_hw).astype(o_ref.dtype)


def _choose_tiles(rows, hw, acc_itemsize, sub, per_buf):
    """Pick (row_tile, hw_tile).

    Row tile is sized from the per-buffer VMEM budget (no artificial cap), rounded to
    the sublane-packing multiple, and capped at ~rows/2 so the parallel row axis has
    >= 2 tiles (v7x dual-TC sharding; negligible cost on single-TC v5e/v6e).  The
    reduction axis is only tiled when the full H*W extent cannot fit in one block.
    `acc_itemsize` is the in-kernel (f32) footprint per element, so sub-32-bit inputs
    don't blow VMEM through upcast temporaries.
    """
    row_cap = _round_up((rows + 1) // 2, sub) if rows > sub else rows

    if sub * hw * acc_itemsize <= per_buf:
        # Common path: whole H*W in one block.
        thw = hw
        tr = (per_buf // (hw * acc_itemsize)) // sub * sub   # >= sub by branch condition
        tr = min(tr, row_cap)
    else:
        # Rare huge-H*W path: tile the reduction axis too; keep tr small so the
        # (tr, 128) lane-dense partial sum stays register-friendly.
        tr = min(rows, 128, row_cap)
        thw = per_buf // (max(tr, 1) * acc_itemsize)
        thw = max(128, (thw // 128) * 128)
        thw = min(thw, 128 * _MAX_LANE_GROUPS, hw)

    if tr >= rows:
        tr = rows   # a block equal to the full array dim is always legal
    return tr, thw


def global_avg_pool2d(x: jax.Array, *, _tile_hw=None) -> jax.Array:
    """x: (N, C, H, W) -> (N, C, 1, 1), averaging over H and W.

    `_tile_hw` is a test-only hook that forces reduction-axis tiling at small shapes.
    """
    N, C, H, W = x.shape
    rows = N * C
    hw = H * W
    x2 = x.reshape(rows, hw)

    itemsize = jnp.dtype(x2.dtype).itemsize
    sub = max(8, 32 // itemsize)          # sublane packing: 8 f32 / 16 bf16 / 32 int8-fp8
    acc_itemsize = max(itemsize, 4)       # f32 accumulation footprint
    per_buf, vmem_limit = _vmem_budgets()

    tr, thw = _choose_tiles(rows, hw, acc_itemsize, sub, per_buf)

    if _tile_hw is not None:              # test hook: force hw tiling at small shapes
        forced = max(128, (_tile_hw // 128) * 128)
        if forced < hw:
            thw = forced
            tr = min(tr, 128)
            if tr >= rows:
                tr = rows

    grid = (pl.cdiv(rows, tr), pl.cdiv(hw, thw))
    single = thw == hw                    # single hw tile -> no accumulator needed

    if single:
        kernel = functools.partial(_gap_kernel_single, inv_hw=1.0 / hw)
        scratch = []
    else:
        kernel = functools.partial(_gap_kernel_tiled, hw=hw, thw=thw, inv_hw=1.0 / hw)
        scratch = [pltpu.VMEM((tr, 128), jnp.float32)]

    out = pl.pallas_call(
        kernel,
        out_shape=jax.ShapeDtypeStruct((rows, 1), x.dtype),
        grid_spec=pltpu.PrefetchScalarGridSpec(
            num_scalar_prefetch=0,
            grid=grid,
            in_specs=[pl.BlockSpec((tr, thw), lambda i, k: (i, k))],
            out_specs=pl.BlockSpec((tr, 1), lambda i, k: (i, 0)),
            scratch_shapes=scratch,
        ),
        compiler_params=pltpu.CompilerParams(
            # Row tiles are independent -> shard across v7x's 2 TensorCores;
            # HW is the reduction axis (output/accumulator carried across it).
            dimension_semantics=("parallel", "arbitrary"),
            vmem_limit_bytes=vmem_limit,
        ),
        cost_estimate=pl.CostEstimate(
            flops=rows * hw,
            transcendentals=0,
            bytes_accessed=rows * hw * itemsize + rows * itemsize,
        ),
    )(x2)

    return out.reshape(N, C, 1, 1)


if __name__ == "__main__":
    key = jax.random.PRNGKey(0)

    # Primary check: f32, shapes matching the module's toy usage.
    x = jax.random.normal(key, (2, 4, 16, 16), dtype=jnp.float32)
    y = global_avg_pool2d(x)
    jax.block_until_ready(y)
    y_ref = jnp.mean(x, axis=(2, 3), keepdims=True)
    assert y.shape == (2, 4, 1, 1), y.shape
    assert jnp.allclose(y, y_ref, atol=1e-5, rtol=1e-5)

    # bf16 input (HBM-bound op -> bf16 halves bytes read); f32 accumulation in-kernel.
    xb = x.astype(jnp.bfloat16)
    yb = global_avg_pool2d(xb)
    jax.block_until_ready(yb)
    yb_ref = jnp.mean(xb.astype(jnp.float32), axis=(2, 3), keepdims=True)
    assert yb.shape == (2, 4, 1, 1), yb.shape
    assert jnp.allclose(yb.astype(jnp.float32), yb_ref, atol=1e-2, rtol=1e-2)

    # Non-aligned shape (rows / hw not multiples of 8 / 128): full-dim blocks.
    x3 = jax.random.normal(jax.random.PRNGKey(1), (3, 5, 7, 9), dtype=jnp.float32)
    y3 = global_avg_pool2d(x3)
    jax.block_until_ready(y3)
    assert jnp.allclose(y3, jnp.mean(x3, axis=(2, 3), keepdims=True), atol=1e-5, rtol=1e-5)

    # Multi-row-tile path (>= 2 row tiles so v7x can use both TensorCores).
    x4 = jax.random.normal(jax.random.PRNGKey(2), (4, 32, 28, 28), dtype=jnp.float32)
    y4 = global_avg_pool2d(x4)
    jax.block_until_ready(y4)
    assert jnp.allclose(y4, jnp.mean(x4, axis=(2, 3), keepdims=True), atol=1e-5, rtol=1e-5)

    # Reduction-tiled path (normally only for huge H*W), forced via the test hook:
    # exact-multiple tiles and a masked partial last tile.
    x5 = jax.random.normal(jax.random.PRNGKey(3), (2, 4, 16, 16), dtype=jnp.float32)
    y5 = global_avg_pool2d(x5, _tile_hw=128)   # hw=256, 256 % 128 == 0
    jax.block_until_ready(y5)
    assert jnp.allclose(y5, jnp.mean(x5, axis=(2, 3), keepdims=True), atol=1e-5, rtol=1e-5)

    x6 = jax.random.normal(jax.random.PRNGKey(4), (1, 2, 20, 10), dtype=jnp.float32)
    y6 = global_avg_pool2d(x6, _tile_hw=128)   # hw=200 = 128 + 72 (masked last tile)
    jax.block_until_ready(y6)
    assert jnp.allclose(y6, jnp.mean(x6, axis=(2, 3), keepdims=True), atol=1e-5, rtol=1e-5)

    print("KERNEL_OK")
</pallas_src>

<mosaic_0001>
module attributes {stable_mosaic.version = 11 : i64} {
  func.func @_gap_kernel_single(%arg0: i32, %arg1: i32, %arg2: memref<8x256xf32, #tpu.memory_space<vmem>>, %arg3: memref<8x1xf32, #tpu.memory_space<vmem>>) attributes {dimension_semantics = [#tpu.dimension_semantics<parallel>, #tpu.dimension_semantics<arbitrary>], iteration_bounds = array<i64: 1, 1>, scalar_prefetch = 0 : i64, scratch_operands = 0 : i64, tpu.core_type = #tpu.core_type<tc>, window_params = [{transform_indices = @transform_0, window_bounds = array<i64: 8, 256>}, {transform_indices = @transform_1, window_bounds = array<i64: 8, 1>}]} {
    %c0 = arith.constant 0 : index
    %c0_0 = arith.constant 0 : index
    %0 = vector.load %arg2[%c0, %c0_0] : memref<8x256xf32, #tpu.memory_space<vmem>>, vector<8x256xf32>
    %cst = arith.constant dense<0.000000e+00> : vector<8xf32>
    %1 = vector.multi_reduction <add>, %0, %cst [1] : vector<8x256xf32> to vector<8xf32>
    %2 = vector.shape_cast %1 : vector<8xf32> to vector<8x1xf32>
    %cst_1 = arith.constant 3.906250e-03 : f32
    %3 = vector.broadcast %cst_1 : f32 to vector<8x1xf32>
    %4 = arith.mulf %2, %3 : vector<8x1xf32>
    %c0_2 = arith.constant 0 : index
    %c0_3 = arith.constant 0 : index
    %5 = vector.load %arg3[%c0_2, %c0_3] : memref<8x1xf32, #tpu.memory_space<vmem>>, vector<8x1xf32>
    tpu.vector_store %arg3[%c0_2, %c0_3], %4 {strides = array<i32>} : memref<8x1xf32, #tpu.memory_space<vmem>>, vector<8x1xf32>,
    return
  }
  func.func @transform_0(%arg0: i32, %arg1: i32) -> (i32, i32) {
    %c0_i32 = arith.constant 0 : i32
    return %arg0, %arg1 : i32, i32
  }
  func.func @transform_1(%arg0: i32, %arg1: i32) -> (i32, i32) {
    %c0_i32 = arith.constant 0 : i32
    %c0_i32_0 = arith.constant 0 : i32
    return %arg0, %c0_i32 : i32, i32
  }
}

</mosaic_0001>

<bundles_post_ra>
// kernel: tpu_custom_call.1
= control target key start
LH: loop header
LB: loop body
LE: loop exit
PB: predicated region body
PF: predicated region fallthrough
CT: control target
= control target key end

     0   :  { %6 = vsyncpa [#allocation3], 0  ;;  %s56_s6 = smov [#allocation2]   ;;  %s73_s0 = inlined_call_operand.hbm [shape: f32[8,256], index: 0, kind: input, shape index: {}]   ;;  %s74_s1 = inlined_call_operand.vmem [shape: f32[8,1], index: 1, kind: output, shape index: {}]  }
   0x1   :  { %s13_s7 = sshll.u32 %s56_s6, 4  ;;  %s14_s7 = int_to_ptr.vmem [resolvable:$true] %s13_s7 }
   0x2   :  { %s42_s8 = scalar_lea.vmem %s14_s7, 256  ;;  %p47_p1 = scmp.lt.s32.totalorder %s14_s7, %s14_s7 }
   0x3   :  { %p43_p0 = scmp.ne.s32.totalorder %s14_s7, %s42_s8  ;;  %p48_p2 = scmp.lt.s32.totalorder %s42_s8, %s42_s8 }
   0x5   :  { %p49_p3 = por %p48_p2, %p47_p1 }
   0x7   :  { %p50_p4 = pnand %p49_p3, %p43_p0 }
   0x9   :  { %53 = shalt.err (!%p50_p4)
}
   0xa   :  { %16 = dma.hbm_to_vmem [thread:$0]  %s73_s0, 256, %s14_s7, [#allocation3]  }
   0xb   :  { %54 = dma.done.wait [#allocation3], 256  }
   0xc   :  { %55 = vsyncadd [#allocation3], 4294967040  ;;  %v20_v0 = vld [vmem:[#allocation2] sm:$0xff]  ;;  %v21_v1 = vld [vmem:[#allocation2 + $0x8] sm:$0xff]  ;;  %vm26_vm0 = vcmask 7168  }
   0xd   :  { %v22_v2 = vadd.f32 %v21_v1, %v20_v0 }
   0xf   :  { %23 = vadd.xlane.f32.xlu0 %v22_v2 }
  0x98   :  { %v24_v3 = vpop.xlane.xlu0 %23 }
  0x99   :  { %v25_v4 = vmul.f32 0.00390625, %v24_v3 }
  0x9b   :  { %27 = vst.msk [vmem:[%s74_s1] sm:$0xff] %vm26_vm0, %v25_v4 }
  0x9c   :  { %32 = vsyncpa [#allocation3], 1 }

</bundles_post_ra>
